<compile_context>
chip_gen: v6e
topology: v6e:2x2x1
jax: 0.10.0
libtpu: 0.0.40
codegen_flags: <defaults>
</compile_context>

<pallas_src>
import functools
import math

import jax
import jax.numpy as jnp
from jax import lax
from jax.experimental import pallas as pl
from jax.experimental.pallas import tpu as pltpu


def _reading_kernel(x_ref, w_ref, mem_ref, key_ref, val_ref):
    # Per grid step (one batch element b):
    #   x_ref:   (1, S, I)
    #   w_ref:   (H, I)       (shared across grid steps)
    #   mem_ref: (1, M, H)
    #   key_ref: (1, S, H)
    #   val_ref: (1, S, M)
    x = x_ref[0]            # [S, I]
    w = w_ref[...]          # [H, I]

    # keys = relu(x @ W^T): contract over the shared last axis (no transpose).
    pre = lax.dot_general(
        x, w,
        dimension_numbers=(((1,), (1,)), ((), ())),
        preferred_element_type=jnp.float32,
    )                                                    # [S, H] f32
    key = jnp.maximum(pre, 0.0)                          # ReLU on the VPU, f32
    key_ref[0] = key.astype(key_ref.dtype)

    # vals[s, m] = sum_h key[s, h] * mem[m, h]  ==  key @ mem^T  (no transpose).
    mem = mem_ref[0]                                     # [M, H]
    val = lax.dot_general(
        key, mem,
        dimension_numbers=(((1,), (1,)), ((), ())),
        preferred_element_type=jnp.float32,
    )                                                    # [S, M]
    # Single merged store for this batch element (review item).
    val_ref[0] = val.astype(val_ref.dtype)


def reading_layer_relu(x, w, mem):
    B, S, I = x.shape
    H, I2 = w.shape
    assert I == I2
    Bm, M, Hm = mem.shape
    assert Bm == B and Hm == H

    itemsize = jnp.dtype(x.dtype).itemsize
    flops = 2 * B * S * I * H + 2 * B * S * H * M
    bytes_accessed = itemsize * (B * S * I + H * I + B * M * H + B * S * H + B * S * M)

    keys, vals = pl.pallas_call(
        _reading_kernel,
        out_shape=(
            jax.ShapeDtypeStruct((B, S, H), x.dtype),
            jax.ShapeDtypeStruct((B, S, M), x.dtype),
        ),
        grid=(B,),
        in_specs=[
            pl.BlockSpec((1, S, I), lambda b: (b, 0, 0)),   # x, per batch
            pl.BlockSpec((H, I), lambda b: (0, 0)),          # W, shared
            pl.BlockSpec((1, M, H), lambda b: (b, 0, 0)),   # mem, per batch
        ],
        out_specs=(
            pl.BlockSpec((1, S, H), lambda b: (b, 0, 0)),   # keys
            pl.BlockSpec((1, S, M), lambda b: (b, 0, 0)),   # vals
        ),
        compiler_params=pltpu.CompilerParams(
            dimension_semantics=("parallel",),               # megacore on v7x
        ),
        cost_estimate=pl.CostEstimate(
            flops=flops, transcendentals=0, bytes_accessed=bytes_accessed),
    )(x, w, mem)

    return keys, vals


def xavier_uniform(key, shape, gain):
    fan_out, fan_in = shape
    bound = gain * math.sqrt(6.0 / (fan_in + fan_out))
    return jax.random.uniform(key, shape, jnp.float32, -bound, bound)


if __name__ == "__main__":
    B, S, INPUT, HIDDEN, M = 2, 8, 32, 32, 16

    root = jax.random.PRNGKey(0)
    k_w, k_x, k_mem = jax.random.split(root, 3)

    W = xavier_uniform(k_w, (HIDDEN, INPUT), gain=math.sqrt(2.0))
    x = jax.random.normal(k_x, (B, S, INPUT), jnp.float32)
    mem = jax.random.normal(k_mem, (B, M, HIDDEN), jnp.float32)

    keys, vals = reading_layer_relu(x, W, mem)
    jax.block_until_ready((keys, vals))

    # Reference check in plain JAX (same math as the PyTorch time loop).
    keys_ref = jnp.maximum(jnp.einsum("bsi,hi->bsh", x, W), 0.0)
    vals_ref = jnp.einsum("bsh,bmh->bsm", keys_ref, mem)
    assert keys.shape == (B, S, HIDDEN) and vals.shape == (B, S, M)
    assert jnp.allclose(keys, keys_ref, atol=1e-5, rtol=1e-5)
    assert jnp.allclose(vals, vals_ref, atol=1e-5, rtol=1e-5)

    print("KERNEL_OK")
</pallas_src>

<mosaic_0001>
module attributes {stable_mosaic.version = 11 : i64} {
  func.func @_reading_kernel(%arg0: i32, %arg1: memref<1x8x32xf32, #tpu.memory_space<vmem>>, %arg2: memref<32x32xf32, #tpu.memory_space<vmem>>, %arg3: memref<1x16x32xf32, #tpu.memory_space<vmem>>, %arg4: memref<1x8x32xf32, #tpu.memory_space<vmem>>, %arg5: memref<1x8x16xf32, #tpu.memory_space<vmem>>) attributes {dimension_semantics = [#tpu.dimension_semantics<parallel>], iteration_bounds = array<i64: 2>, scalar_prefetch = 0 : i64, scratch_operands = 0 : i64, tpu.core_type = #tpu.core_type<tc>, window_params = [{transform_indices = @transform_0, window_bounds = array<i64: 1, 8, 32>}, {pipeline_mode = #tpu.pipeline_mode<synchronous>, transform_indices = @transform_1, window_bounds = array<i64: 32, 32>}, {transform_indices = @transform_2, window_bounds = array<i64: 1, 16, 32>}, {transform_indices = @transform_3, window_bounds = array<i64: 1, 8, 32>}, {transform_indices = @transform_4, window_bounds = array<i64: 1, 8, 16>}]} {
    %c0 = arith.constant 0 : index
    %c0_0 = arith.constant 0 : index
    %c0_1 = arith.constant 0 : index
    %0 = vector.load %arg1[%c0, %c0_0, %c0_1] : memref<1x8x32xf32, #tpu.memory_space<vmem>>, vector<1x8x32xf32>
    %1 = vector.shape_cast %0 : vector<1x8x32xf32> to vector<8x32xf32>
    %c0_2 = arith.constant 0 : index
    %c0_3 = arith.constant 0 : index
    %2 = vector.load %arg2[%c0_2, %c0_3] : memref<32x32xf32, #tpu.memory_space<vmem>>, vector<32x32xf32>
    %cst = arith.constant dense<0.000000e+00> : vector<8x32xf32>
    %3 = tpu.matmul %1, %2, %cst {dimension_numbers = #tpu.dot_dimension_numbers<[1], [1], [0], [0], [0, 0, 1, 0], [], []>} : vector<8x32xf32>, vector<32x32xf32>, vector<8x32xf32> -> vector<8x32xf32>
    %cst_4 = arith.constant 0.000000e+00 : f32
    %4 = vector.broadcast %cst_4 : f32 to vector<8x32xf32>
    %5 = arith.maximumf %3, %4 : vector<8x32xf32>
    %c0_5 = arith.constant 0 : index
    %c0_6 = arith.constant 0 : index
    %c0_7 = arith.constant 0 : index
    %6 = vector.load %arg4[%c0_5, %c0_6, %c0_7] : memref<1x8x32xf32, #tpu.memory_space<vmem>>, vector<1x8x32xf32>
    %7 = vector.shape_cast %6 : vector<1x8x32xf32> to vector<8x32xf32>
    %8 = vector.shape_cast %5 : vector<8x32xf32> to vector<1x8x32xf32>
    tpu.vector_store %arg4[%c0_5, %c0_6, %c0_7], %8 {strides = array<i32>} : memref<1x8x32xf32, #tpu.memory_space<vmem>>, vector<1x8x32xf32>,
    %c0_8 = arith.constant 0 : index
    %c0_9 = arith.constant 0 : index
    %c0_10 = arith.constant 0 : index
    %9 = vector.load %arg3[%c0_8, %c0_9, %c0_10] : memref<1x16x32xf32, #tpu.memory_space<vmem>>, vector<1x16x32xf32>
    %10 = vector.shape_cast %9 : vector<1x16x32xf32> to vector<16x32xf32>
    %cst_11 = arith.constant dense<0.000000e+00> : vector<8x16xf32>
    %11 = tpu.matmul %5, %10, %cst_11 {dimension_numbers = #tpu.dot_dimension_numbers<[1], [1], [0], [0], [0, 0, 1, 0], [], []>} : vector<8x32xf32>, vector<16x32xf32>, vector<8x16xf32> -> vector<8x16xf32>
    %c0_12 = arith.constant 0 : index
    %c0_13 = arith.constant 0 : index
    %c0_14 = arith.constant 0 : index
    %12 = vector.load %arg5[%c0_12, %c0_13, %c0_14] : memref<1x8x16xf32, #tpu.memory_space<vmem>>, vector<1x8x16xf32>
    %13 = vector.shape_cast %12 : vector<1x8x16xf32> to vector<8x16xf32>
    %14 = vector.shape_cast %11 : vector<8x16xf32> to vector<1x8x16xf32>
    tpu.vector_store %arg5[%c0_12, %c0_13, %c0_14], %14 {strides = array<i32>} : memref<1x8x16xf32, #tpu.memory_space<vmem>>, vector<1x8x16xf32>,
    return
  }
  func.func @transform_0(%arg0: i32) -> (i32, i32, i32) {
    %c0_i32 = arith.constant 0 : i32
    %c0_i32_0 = arith.constant 0 : i32
    %c0_i32_1 = arith.constant 0 : i32
    return %arg0, %c0_i32, %c0_i32_0 : i32, i32, i32
  }
  func.func @transform_1(%arg0: i32) -> (i32, i32) {
    %c0_i32 = arith.constant 0 : i32
    %c0_i32_0 = arith.constant 0 : i32
    %c0_i32_1 = arith.constant 0 : i32
    return %c0_i32, %c0_i32_0 : i32, i32
  }
  func.func @transform_2(%arg0: i32) -> (i32, i32, i32) {
    %c0_i32 = arith.constant 0 : i32
    %c0_i32_0 = arith.constant 0 : i32
    %c0_i32_1 = arith.constant 0 : i32
    return %arg0, %c0_i32, %c0_i32_0 : i32, i32, i32
  }
  func.func @transform_3(%arg0: i32) -> (i32, i32, i32) {
    %c0_i32 = arith.constant 0 : i32
    %c0_i32_0 = arith.constant 0 : i32
    %c0_i32_1 = arith.constant 0 : i32
    return %arg0, %c0_i32, %c0_i32_0 : i32, i32, i32
  }
  func.func @transform_4(%arg0: i32) -> (i32, i32, i32) {
    %c0_i32 = arith.constant 0 : i32
    %c0_i32_0 = arith.constant 0 : i32
    %c0_i32_1 = arith.constant 0 : i32
    return %arg0, %c0_i32, %c0_i32_0 : i32, i32, i32
  }
}

</mosaic_0001>

<bundles_post_ra>
// kernel: tpu_custom_call.1
= control target key start
LH: loop header
LB: loop body
LE: loop exit
PB: predicated region body
PF: predicated region fallthrough
CT: control target
= control target key end

     0   :  { %10 = vsyncpa [#allocation3], 0  ;;  %s1220_s0 = inlined_call_operand.hbm [shape: f32[2,8,32], index: 0, kind: input, shape index: {}]   ;;  %s1221_s1 = inlined_call_operand.hbm [shape: f32[32,32], index: 1, kind: input, shape index: {}]   ;;  %s1222_s2 = inlined_call_operand.hbm [shape: f32[2,16,32], index: 2, kind: input, shape index: {}]   ;;  %s1223_s3 = inlined_call_operand.hbm [shape: f32[2,8,32], index: 3, kind: output, shape index: {0}]   ;;  %s1224_s4 = inlined_call_operand.hbm [shape: f32[2,8,16], index: 4, kind: output, shape index: {1}]  }
   0x1   :  { %12 = vsyncpa [#allocation3 + $0x1], 0 }
   0x2   :  { %13 = vsyncpa [#allocation6], 0 }
   0x3   :  { %14 = vsyncpa [#allocation4], 0 }
   0x4   :  { %16 = vsyncpa [#allocation4 + $0x1], 0 }
   0x5   :  { %17 = vsyncpa [#allocation10], 0 }
   0x6   :  { %19 = vsyncpa [#allocation10 + $0x1], 0  ;;  %s963_s15 = smov 0   ;;  %s965_s16 = smov 0  }
   0x7   :  { %s967_s17 = smov 0   ;;  %s969_s18 = smov 0  }
   0x8 LB: > { %s984_s19 = sadd.s32 1, %s927_s18   ;;  %s32_s20 = sadd.s32 1, %s923_s17  ;;  %s927_s18 = sphi %s969_s18, %s1247_s18   ;;  %s923_s17 = sphi %s967_s17, %s1246_s17   ;;  %s919_s16 = sphi %s965_s16, %s1245_s16   ;;  %s915_s15 = sphi %s963_s15, %s1244_s15  }
   0x9   : > { %s29_s21 = ssub.s32 %s927_s18, %s984_s19  ;;  %p1225_p0 = scmp.ne.s32.totalorder %s923_s17, %s919_s16 }
   0xa   : > { %p30_p1 = scmp.eq.s32.totalorder %s29_s21, 0  ;;  %p40_p2 = scmp.eq.s32.totalorder %s927_s18, 0 }
   0xb   : > { %p703_p4 = scmp.lt.s32.totalorder %s927_s18, 2  ;;  %s181_s23 = sand.u32 1, %s927_s18  }
   0xc   : > { %s995_s22 = scalar_select %p30_p1, %s923_s17, %s32_s20  }
   0xd   : > { %p41_p5 = por %p40_p2, %p1225_p0  ;;  %s183_s24 = sand.u32 1, %s923_s17  }
   0xe   : > { %s620_s25 = sshll.u32 %s183_s24, 3  ;;  %s621_s26 = sshll.u32 %s927_s18, 7 }
   0xf   : > { %s1006_s29 = scalar_lea.hbm %s1220_s0, %s621_s26  ;;  %s185_s30 = scalar_lea.vmem [#allocation2], %s620_s25 }
  0x10   : > { %s192_s5 = sshll.u32 %s185_s30, 4  ;;  %p1008_p6 = pnand %p703_p4, %p41_p5  ;;  %s193_s5 = int_to_ptr.vmem [resolvable:$true] %s192_s5 }
  0x11   : > { %s622_s7 = sshll.u32 %s183_s24, 4  ;;  %s1012_s8 = scalar_lea.sflag [#allocation3], %s181_s23 }
  0x12   : > { %s743_s9 = scalar_lea.hbm %s1006_s29, 128  ;;  %p745_p8 = pneg %p1008_p6 }
  0x13   : > { %p744_p7 = scmp.ne.s32.totalorder %s1006_s29, %s743_s9  ;;  %s748_s12 = scalar_lea.hbm %s1220_s0, 256 }
  0x14   : > { %p749_p11 = scmp.lt.s32.totalorder %s1006_s29, %s1220_s0  ;;  %p750_p12 = scmp.lt.s32.totalorder %s748_s12, %s743_s9 }
  0x15   : > { %p746_p9 = pnand %p745_p8, %p744_p7 }
  0x16   : > { %p751_p13 = por %p750_p12, %p749_p11 }
  0x17   : > { %p747_p10 = pneg %p746_p9 }
  0x19   : > { %p752_p1 = pnand %p751_p13, %p747_p10 }
  0x1b   : > { %755 = shalt.err (!%p752_p1)
}
  0x1c   : > { %s756_s20 = scalar_lea.vmem %s193_s5, 128  ;;  %s929_s21 = smov [#allocation2]  }
  0x1d   : > { %p757_p2 = scmp.ne.s32.totalorder %s193_s5, %s756_s20  ;;  %s761_s23 = sshll.u32 %s929_s21, 4  ;;  %s762_s23 = int_to_ptr.vmem [resolvable:$false] %s761_s23 }
  0x1e   : > { %s763_s24 = scalar_lea.vmem %s762_s23, 256  ;;  %p764_p7 = scmp.lt.s32.totalorder %s193_s5, %s762_s23 }
  0x1f   : > { %p759_p4 = pnand %p757_p2, %p745_p8  ;;  %p765_p9 = scmp.lt.s32.totalorder %s763_s24, %s756_s20 }
  0x21   : > { %p760_p5 = pneg %p759_p4  ;;  %p766_p3 = por %p765_p9, %p764_p7 }
  0x23   : > { %p767_p0 = pnand %p766_p3, %p760_p5 }
  0x25   : > { %770 = shalt.err (!%p767_p0)
}
  0x26   : > { %691 = dma.hbm_to_vmem [thread:$0]  (!%p1008_p6), %s1006_s29, 128, %s193_s5, %s1012_s8  }
  0x27   : > { %s203_s25 = scalar_lea.vmem [#allocation7], %s622_s7  ;;  %s1036_s27 = sadd.s32 4294967295, %s927_s18  }
  0x28   : > { %s210_s26 = sshll.u32 %s203_s25, 4  ;;  %s616_s28 = sadd.s32 4294967294, %s927_s18   ;;  %s1062_s26 = int_to_ptr.vmem [resolvable:$true] %s210_s26 }
  0x29   : > { %p45_p0 = scmp.ne.s32.totalorder %s919_s16, %s915_s15  ;;  %p1226_p3 = scmp.eq.s32.totalorder %s1036_s27, 0 }
  0x2a   : > { %p116_p10 = scmp.eq.s32.totalorder %s1036_s27, 1  ;;  %p122_p11 = scmp.eq.s32.totalorder %s616_s28, 1 }
  0x2b   : > { %p1045_p12 = por %p1226_p3, %p45_p0  ;;  %p617_p13 = scmp.ge.s32.totalorder %s927_s18, 1 }
  0x2c   : > { %p1232_p1 = scmp.ne.s32.totalorder %s923_s17, %s919_s16  ;;  %p1057_p4 = por %p122_p11, %p45_p0 }
  0x2d   : > { %s1231_s30 = scalar_select %p1045_p12, 1, 0 }
  0x2e   : > { %p1053_p2 = por %p116_p10, %p1232_p1  ;;  %p155_p5 = scmp.lt.s32.totalorder %s927_s18, 3 }
  0x2f   : > { %s1234_s5 = scalar_select %p1057_p4, 1, 0 }
  0x30   : > { %s1233_s29 = scalar_select %p1053_p2, 1, 0 }
  0x31   : > { %p1064_p7 = pnand %p617_p13, %p155_p5  ;;  %s930_s9 = smov [#allocation5]  }
  0x32   : > { %s167_s10 = sshll.u32 %s930_s9, 4  ;;  %s645_s11 = sshll.u32 %s927_s18, 8  ;;  %s1076_s10 = int_to_ptr.vmem [resolvable:$true] %s167_s10 }
  0x33   : > { %s1235_s7 = scalar_select %p1064_p7, 1, 0 }
  0x34   : > { %p684_p9 = pneg %p1064_p7  ;;  %s1074_s14 = scalar_lea.hbm %s1222_s2, %s645_s11 }
  0x35   : > { %s771_s21 = scalar_lea.hbm %s1074_s14, 256  ;;  %s776_s25 = scalar_lea.hbm %s1222_s2, 512 }
  0x36   : > { %p1080_p0 = pnand %p684_p9, %p1226_p3  ;;  %p772_p10 = scmp.ne.s32.totalorder %s1074_s14, %s771_s21 }
  0x37   : > { %p777_p1 = scmp.lt.s32.totalorder %s1074_s14, %s1222_s2  ;;  %p778_p5 = scmp.lt.s32.totalorder %s776_s25, %s771_s21 }
  0x38   : > { %p774_p11 = pnand %p772_p10, %p745_p8 }
  0x39   : > { %p779_p4 = por %p778_p5, %p777_p1 }
  0x3a   : > { %p775_p13 = pneg %p774_p11 }
  0x3c   : > { %p780_p9 = pnand %p779_p4, %p775_p13 }
  0x3e   : > { %783 = shalt.err (!%p780_p9)
}
  0x3f   : > { %s784_s11 = scalar_lea.vmem %s1062_s26, 256  ;;  %s931_s12 = smov [#allocation7]  }
  0x40   : > { %p785_p3 = scmp.ne.s32.totalorder %s1062_s26, %s784_s11  ;;  %s789_s13 = sshll.u32 %s931_s12, 4  ;;  %s790_s13 = int_to_ptr.vmem [resolvable:$false] %s789_s13 }
  0x41   : > { %s791_s23 = scalar_lea.vmem %s790_s13, 512  ;;  %p792_p2 = scmp.lt.s32.totalorder %s1062_s26, %s790_s13 }
  0x42   : > { %p787_p10 = pnand %p785_p3, %p745_p8  ;;  %p793_p12 = scmp.lt.s32.totalorder %s791_s23, %s784_s11 }
  0x44   : > { %p788_p11 = pneg %p787_p10  ;;  %p794_p7 = por %p793_p12, %p792_p2 }
  0x46   : > { %p795_p1 = pnand %p794_p7, %p788_p11 }
  0x48   : > { %798 = shalt.err (!%p795_p1)
}
  0x49   : > { %s932_s21 = smov 128   ;;  %s933_s24 = smov 8  }
  0x4a   : > { %694 = dma.hbm_to_vmem [thread:$0]  (!%p1008_p6), %s1074_s14, 256, %s1062_s26, %s1012_s8, %s932_s21, %s932_s21, %s933_s24  }
  0x4b   : > { %p801_p8 = pneg %p1080_p0  ;;  %s810_s25 = scalar_lea.vmem %s1076_s10, 512 }
  0x4c   : > { %p811_p3 = scmp.ne.s32.totalorder %s1076_s10, %s810_s25  ;;  %p818_p2 = scmp.lt.s32.totalorder %s1076_s10, %s1076_s10 }
  0x4d   : > { %p819_p7 = scmp.lt.s32.totalorder %s810_s25, %s810_s25 }
  0x4e   : > { %p813_p4 = pnand %p811_p3, %p801_p8 }
  0x4f   : > { %p820_p13 = por %p819_p7, %p818_p2 }
  0x50   : > { %p814_p12 = pneg %p813_p4 }
  0x52   : > { %p821_p5 = pnand %p820_p13, %p814_p12 }
  0x54   : > { %824 = shalt.err (!%p821_p5)
}
  0x55   : > { %687 = dma.hbm_to_vmem [thread:$0]  (!%p1080_p0), %s1221_s1, 512, %s1076_s10, [#allocation6], %s932_s21, %s932_s21, %s933_s24  }
  0x56   : > { %p1237_p6 = scmp.ne.s32.totalorder %s1235_s7, 0 }
  0x57   : > { %s224_s6 = sand.u32 (!%p1237_p6), 1, %s1036_s27   ;;  %s1123_s8 = sand.u32 (!%p1237_p6), 1, %s919_s16  }
  0x58   : > { %222 = sbr.rel (%p1237_p6) target bundleno = 520 (0x208), region = 32  ;;  %s1126_s26 = sshll.u32 (!%p1237_p6), %s1123_s8, 3 }
  0x59   : > { %s225_s14 = scalar_lea.sflag (!%p1237_p6), [#allocation3], %s224_s6  ;;  %s228_s20 = scalar_lea.vmem (!%p1237_p6), [#allocation2], %s1126_s26 }
  0x5a   : > { %p1238_p9 = scmp.ne.s32.totalorder (!%p1237_p6), %s1231_s30, 0 }
  0x5d   : > { %894 = dma.done.wait (%p1238_p9), %s225_s14, 128  }
  0x5e   : > { %896 = vsyncadd (%p1238_p9), %s225_s14, 4294967168  ;;  %p1239_p0 = scmp.eq.s32.totalorder %s1036_s27, 0 }
  0x60   : > { %898 = dma.done.wait (%p1239_p0), [#allocation6], 512   ;;  %p1240_p10 = pmov %p1239_p0 }
  0x61   : > { %s628_s7 = sshll.u32 %s1123_s8, 4 }
  0x62   : > { %900 = vsyncadd (%p1240_p10), [#allocation6], 4294966784  ;;  %s241_s10 = scalar_lea.vmem [#allocation7], %s628_s7 }
  0x63   : > { %902 = dma.done.wait (%p1238_p9), %s225_s14, 256  }
  0x64   : > { %904 = vsyncadd (%p1238_p9), %s225_s14, 4294967040  ;;  %v934_v0 = vmov 0.0   ;;  %vm935_vm0 = vmmov 0   ;;  %vm281_vm1 = vcmask 261120   ;;  %v280_v1 = vld [vmem:[#allocation5 + $0x18] sm:$0xff]  ;;  %v279_v3 = vld [vmem:[#allocation5 + $0x10] sm:$0xff] }
  0x65   : > { %654 = vmatprep.subr.mxu0 %v934_v0  ;;  %662 = vmatprep.mubr.msk.f32.mxu0 %vm935_vm0, %v934_v0  ;;  %v370_v2 = vld [vmem:[%s241_s10 + $0x8] sm:$0xff]  ;;  %v277_v5 = vld [vmem:[#allocation5] sm:$0xff]  ;;  %s268_s30 = scalar_lea.vmem [#allocation8], %s1126_s26  ;;  %s641_s11 = sshll.u32 %s1036_s27, 7 }
  0x66   : > { %665 = vmatprep.subr.mxu1 %v934_v0  ;;  %669 = vmatprep.mubr.msk.f32.mxu1 %vm935_vm0, %v934_v0  ;;  %v278_v4 = vld [vmem:[#allocation5 + $0x8] sm:$0xff]  ;;  %v276_v6 = vld [vmem:[%s228_s20] sm:$0xff]  ;;  %v369_v7 = vld [vmem:[%s241_s10] sm:$0xff]  ;;  %s471_s12 = sshll.u32 %s268_s30, 4  ;;  %s469_s21 = scalar_lea.hbm %s1223_s3, %s641_s11  ;;  %s472_s12 = int_to_ptr.vmem [resolvable:$true] %s471_s12 }
  0x67   : > { %655 = vmatpush3.xpose.msk.msra.mxu0 %vm281_vm1, %v280_v1  ;;  %666 = vmatpush3.xpose.msk.msra.mxu1 %vm281_vm1, %v370_v2  ;;  %s453_s24 = scalar_lea.sflag [#allocation4], %s1123_s8  ;;  %s825_s25 = scalar_lea.vmem %s472_s12, 128 }
  0x68   : > { %656 = vmatprep.subr.mxu0 %v934_v0  ;;  %667 = vmatprep.subr.mxu1 %v934_v0  ;;  %p826_p11 = scmp.ne.s32.totalorder %s472_s12, %s825_s25  ;;  %p1241_p1 = scmp.ne.s32.totalorder %s1233_s29, 0 }
  0x69   : > { %s936_s28 = smov [#allocation8]  }
  0x6a   : > { %p827_p8 = pnand %p826_p11, %p1241_p1  ;;  %s829_s9 = sshll.u32 %s936_s28, 4  ;;  %s830_s9 = int_to_ptr.vmem [resolvable:$false] %s829_s9 }
  0x6b   : > { %657 = vmatpush3.xpose.msk.msra.mxu0 %vm281_vm1, %v279_v3  ;;  %668 = vmatpush3.xpose.msk.msra.mxu1 %vm281_vm1, %v369_v7  ;;  %s831_s6 = scalar_lea.vmem %s830_s9, 256  ;;  %p832_p4 = scmp.lt.s32.totalorder %s472_s12, %s830_s9 }
  0x6c   : > { %658 = vmatprep.subr.mxu0 %v934_v0  ;;  %p828_p3 = pneg %p827_p8  ;;  %p833_p12 = scmp.lt.s32.totalorder %s831_s6, %s825_s25 }
  0x6e   : > { %p834_p2 = por %p833_p12, %p832_p4 }
  0x6f   : > { %659 = vmatpush3.xpose.msk.msra.mxu0 %vm281_vm1, %v278_v4 }
  0x70   : > { %660 = vmatprep.subr.mxu0 %v934_v0  ;;  %p835_p7 = pnand %p834_p2, %p828_p3 }
  0x73   : > { %661 = vmatpush3.xpose.msk.msra.mxu0 %vm281_vm1, %v277_v5 }
  0x76   : > { %663 = vmatmul.mubr.msk.f32.vlgmr.msra.gmra.mxu0 %vm281_vm1, %v276_v6 }
 0x136   : > { %v363_v8 = vpop.f32.mrf.mxu0 }
 0x137   : > { %v367_v9 = vmax.f32 %v363_v8, 0.0 }
 0x138   : > { %v664_v10 = vpop.f32.mrf.mxu0 }
 0x139   : > { %670 = vmatmul.mubr.msk.f32.vlgmr.msra.gmra.mxu1 %vm281_vm1, %v367_v9  ;;  %368 = vst.msk [vmem:[%s268_s30] sm:$0xff] %vm281_vm1, %v367_v9 }
 0x13a   : > { %838 = shalt.err (!%p835_p7)
}
 0x13b   : > { %s839_s14 = scalar_lea.hbm %s469_s21, 128  ;;  %s843_s10 = scalar_lea.hbm %s1223_s3, 256 }
 0x13c   : > { %p840_p13 = scmp.ne.s32.totalorder %s469_s21, %s839_s14  ;;  %p844_p9 = scmp.lt.s32.totalorder %s469_s21, %s1223_s3 }
 0x13d   : > { %p845_p0 = scmp.lt.s32.totalorder %s843_s10, %s839_s14 }
 0x13e   : > { %p841_p5 = pnand %p840_p13, %p1241_p1 }
 0x13f   : > { %p846_p10 = por %p845_p0, %p844_p9 }
 0x140   : > { %p842_p6 = pneg %p841_p5 }
 0x142   : > { %p847_p11 = pnand %p846_p10, %p842_p6 }
 0x144   : > { %850 = shalt.err (!%p847_p11)
}
 0x145   : > { %680 = dma.vmem_to_hbm [thread:$0]  (%p1241_p1), %s472_s12, 128, %s469_s21, %s453_s24   ;;  %vm450_vm2 = vcmask 130048  }
 0x146   : > { %s275_s23 = scalar_lea.vmem [#allocation9], %s1126_s26  ;;  %s1177_s6 = scalar_lea.hbm %s1224_s4, %s641_s11 }
 0x147   : > { %s484_s25 = sshll.u32 %s275_s23, 4  ;;  %s458_s14 = scalar_lea.sflag [#allocation10], %s1123_s8  ;;  %s1179_s25 = int_to_ptr.vmem [resolvable:$true] %s484_s25 }
 0x148   : > { %s851_s20 = scalar_lea.vmem %s1179_s25, 128  ;;  %s937_s27 = smov [#allocation9]  }
 0x149   : > { %p852_p8 = scmp.ne.s32.totalorder %s1179_s25, %s851_s20  ;;  %s855_s26 = sshll.u32 %s937_s27, 4  ;;  %s856_s26 = int_to_ptr.vmem [resolvable:$false] %s855_s26 }
 0x14a   : > { %s857_s12 = scalar_lea.vmem %s856_s26, 256  ;;  %p858_p12 = scmp.lt.s32.totalorder %s1179_s25, %s856_s26 }
 0x14b   : > { %p853_p3 = pnand %p852_p8, %p1241_p1  ;;  %p859_p2 = scmp.lt.s32.totalorder %s857_s12, %s851_s20 }
 0x14d   : > { %p854_p4 = pneg %p853_p3  ;;  %p860_p7 = por %p859_p2, %p858_p12 }
 0x14f   : > { %p861_p13 = pnand %p860_p7, %p854_p4 }
 0x1f9   : > { %v446_v11 = vpop.f32.mrf.mxu1 }
 0x1fa   : > { %451 = vst.msk [vmem:[%s275_s23] sm:$0xff] %vm450_vm2, %v446_v11 }
 0x1fb   : > { %v671_v12 = vpop.f32.mrf.mxu1 }
 0x1fc   : > { %864 = shalt.err (!%p861_p13)
}
 0x1fd   : > { %s865_s11 = scalar_lea.hbm %s1177_s6, 128  ;;  %s869_s24 = scalar_lea.hbm %s1224_s4, 256 }
 0x1fe   : > { %p866_p5 = scmp.ne.s32.totalorder %s1177_s6, %s865_s11  ;;  %p870_p0 = scmp.lt.s32.totalorder %s1177_s6, %s1224_s4 }
 0x1ff   : > { %p871_p10 = scmp.lt.s32.totalorder %s869_s24, %s865_s11 }
 0x200   : > { %p867_p6 = pnand %p866_p5, %p1241_p1 }
 0x201   : > { %p872_p11 = por %p871_p10, %p870_p0 }
 0x202   : > { %p868_p9 = pneg %p867_p6 }
 0x204   : > { %p873_p8 = pnand %p872_p11, %p868_p9 }
 0x206   : > { %876 = shalt.err (!%p873_p8)
}
 0x207   : > { %681 = dma.vmem_to_hbm [thread:$0]  (%p1241_p1), %s1179_s25, 128, %s1177_s6, %s458_s14  }
 0x208 PF: > { %s496_s30 = sand.u32 1, %s915_s15   ;;  %p1242_p3 = scmp.ne.s32.totalorder %s1234_s5, 0 }
 0x209   : > { %p1243_p4 = scmp.ge.s32.totalorder %s927_s18, 2  ;;  %s497_s13 = scalar_lea.sflag [#allocation4], %s496_s30 }
 0x20b   : > { %p696_p12 = pnand %p1243_p4, %p1242_p3 }
 0x20d   : > { %p697_p2 = pneg %p696_p12 }
 0x20f   : > { %906 = dma.done.wait (%p697_p2), %s497_s13, 128  }
 0x210   : > { %908 = vsyncadd (%p697_p2), %s497_s13, 4294967168  ;;  %s506_s23 = scalar_lea.sflag [#allocation10], %s496_s30 }
 0x211   : > { %910 = dma.done.wait (%p697_p2), %s506_s23, 128  }
 0x212   : > { %912 = vsyncadd (%p697_p2), %s506_s23, 4294967168  ;;  %p22_p1 = scmp.ge.s32.totalorder %s984_s19, 4   ;;  %s1244_s15 = smov %s919_s16 }
 0x213   : > { %s1245_s16 = smov %s923_s17  ;;  %s1246_s17 = smov %s995_s22 }
 0x214   : > { %s1247_s18 = smov %s984_s19  ;;  %24 = sbr.rel (!%p22_p1) target bundleno = 8 (0x8), region = 109 }
 0x219   :  { %511 = vsyncpa [#allocation3], 1 }
 0x21a   :  { %513 = vsyncpa [#allocation3 + $0x1], 1 }
 0x21b   :  { %514 = vsyncpa [#allocation6], 1 }
 0x21c   :  { %515 = vsyncpa [#allocation4], 1 }
 0x21d   :  { %517 = vsyncpa [#allocation4 + $0x1], 1 }
 0x21e   :  { %518 = vsyncpa [#allocation10], 1 }
 0x21f   :  { %520 = vsyncpa [#allocation10 + $0x1], 1 }

</bundles_post_ra>
